<compile_context>
chip_gen: v7x
topology: tpu7x:2x2x1
jax: 0.10.0
libtpu: 0.0.40
codegen_flags: <defaults>
</compile_context>

<pallas_src>
import math

import jax
import jax.numpy as jnp
from jax.experimental import pallas as pl
from jax.experimental.pallas import tpu as pltpu

_SE2_SIZE = 3      # StateSE2Index.size()
_HEADING = 2       # StateSE2Index.HEADING
_LANE = 128        # TPU lane granule


def _round_up(x: int, m: int) -> int:
    return ((x + m - 1) // m) * m


def _trajectory_head_kernel(x_ref, w1_ref, b1_ref, w2_ref, b2_ref, m_ref, o_ref):
    # x:  (tb, Kp)   bf16      w1: (Kp, Fp)  bf16     b1: (1, Fp)  f32
    # w2: (Fp, Np)   bf16      b2: (1, Np)   f32      m : (1, Np)  f32
    # o:  (tb, Np)   f32
    x = x_ref[...]

    # Linear 1 (bf16 MXU, f32 accumulation) + bias + ReLU in f32.
    h = jnp.dot(x, w1_ref[...], preferred_element_type=jnp.float32) + b1_ref[...]
    h = jnp.maximum(h, 0.0)

    # Linear 2 (bf16 MXU, f32 accumulation) + bias in f32.
    y = (jnp.dot(h.astype(jnp.bfloat16), w2_ref[...],
                 preferred_element_type=jnp.float32) + b2_ref[...])

    # Heading epilogue: m is 1.0 exactly on heading columns, 0.0 elsewhere.
    # tanh runs on the EUP slot; the blend is a single VALU fma-style pattern.
    m = m_ref[...]
    o_ref[...] = (y + m * (jnp.tanh(y) * jnp.float32(math.pi) - y)).astype(o_ref.dtype)


def trajectory_head_forward(object_queries, params, num_poses, *, tb_max=256):
    """object_queries: (..., d_model) f32 -> {'trajectory': (-1, num_poses, 3)} f32."""
    w1, b1, w2, b2 = params["w1"], params["b1"], params["w2"], params["b2"]
    d_model = w1.shape[0]
    d_ffn = w1.shape[1]
    out_dim = w2.shape[1]
    assert out_dim == num_poses * _SE2_SIZE

    # ---- MXU / lane-aligned padded dims ----------------------------------
    kp = _round_up(d_model, _LANE)   # contraction dim of matmul 1
    fp = _round_up(d_ffn, _LANE)     # hidden width
    np_ = _round_up(out_dim, _LANE)  # lane-dense output width

    # ---- batch tiling -----------------------------------------------------
    x2d = object_queries.reshape(-1, d_model)
    batch = x2d.shape[0]
    tb = min(tb_max, _round_up(batch, 8))      # sublane-aligned batch tile
    b_pad = _round_up(batch, tb)
    grid_b = b_pad // tb

    # ---- pack operands (zero-padded, bf16 matmul inputs, f32 biases) -----
    x_p = jnp.zeros((b_pad, kp), jnp.bfloat16).at[:batch, :d_model].set(
        x2d.astype(jnp.bfloat16))
    w1_p = jnp.zeros((kp, fp), jnp.bfloat16).at[:d_model, :d_ffn].set(
        w1.astype(jnp.bfloat16))
    b1_p = jnp.zeros((1, fp), jnp.float32).at[:, :d_ffn].set(b1)
    w2_p = jnp.zeros((fp, np_), jnp.bfloat16).at[:d_ffn, :out_dim].set(
        w2.astype(jnp.bfloat16))
    b2_p = jnp.zeros((1, np_), jnp.float32).at[:, :out_dim].set(b2)

    cols = jnp.arange(np_)
    mask = (((cols % _SE2_SIZE) == _HEADING) & (cols < out_dim)).astype(
        jnp.float32).reshape(1, np_)

    # ---- VMEM budget (double-buffered tiles + resident weights), 2x headroom
    est = (2 * tb * kp * 2            # x tiles (bf16)
           + 2 * tb * np_ * 4         # out tiles (f32)
           + 2 * (kp * fp + fp * np_) * 2   # weights (bf16)
           + 2 * (fp + 2 * np_) * 4   # biases + mask (f32)
           + tb * fp * 4)             # live h intermediate (f32)
    vmem_limit = min(100 * 1024 * 1024, max(16 * 1024 * 1024, 2 * est))

    out = pl.pallas_call(
        _trajectory_head_kernel,
        out_shape=jax.ShapeDtypeStruct((b_pad, np_), jnp.float32),
        grid=(grid_b,),
        in_specs=[
            pl.BlockSpec((tb, kp), lambda i: (i, 0)),
            pl.BlockSpec((kp, fp), lambda i: (0, 0)),
            pl.BlockSpec((1, fp), lambda i: (0, 0)),
            pl.BlockSpec((fp, np_), lambda i: (0, 0)),
            pl.BlockSpec((1, np_), lambda i: (0, 0)),
            pl.BlockSpec((1, np_), lambda i: (0, 0)),
        ],
        out_specs=pl.BlockSpec((tb, np_), lambda i: (i, 0)),
        compiler_params=pltpu.CompilerParams(
            dimension_semantics=("parallel",),
            vmem_limit_bytes=int(vmem_limit),
        ),
    )(x_p, w1_p, b1_p, w2_p, b2_p, mask)

    # Strip batch / lane padding BEFORE the (-1, num_poses, 3) reshape.
    poses = out[:batch, :out_dim].reshape(-1, num_poses, _SE2_SIZE)
    return {"trajectory": poses}


def init_trajectory_head_params(key, num_poses, d_ffn, d_model):
    """Deterministic init mirroring nn.Linear default (uniform +/- 1/sqrt(fan_in))."""
    out_dim = num_poses * _SE2_SIZE
    k1, k2, k3, k4 = jax.random.split(key, 4)
    lim1 = 1.0 / math.sqrt(d_model)
    lim2 = 1.0 / math.sqrt(d_ffn)
    return {
        # stored as (in, out) so the kernel computes x @ W + b
        "w1": jax.random.uniform(k1, (d_model, d_ffn), jnp.float32, -lim1, lim1),
        "b1": jax.random.uniform(k2, (1, d_ffn), jnp.float32, -lim1, lim1),
        "w2": jax.random.uniform(k3, (d_ffn, out_dim), jnp.float32, -lim2, lim2),
        "b2": jax.random.uniform(k4, (1, out_dim), jnp.float32, -lim2, lim2),
    }


def _reference_forward_bf16(object_queries, params, num_poses):
    """Pure-JAX reference with the same bf16-operand / f32-accumulate math."""
    x = object_queries.reshape(-1, params["w1"].shape[0]).astype(jnp.bfloat16)
    w1 = params["w1"].astype(jnp.bfloat16)
    w2 = params["w2"].astype(jnp.bfloat16)
    h = jnp.maximum(
        jnp.dot(x, w1, preferred_element_type=jnp.float32) + params["b1"], 0.0)
    y = (jnp.dot(h.astype(jnp.bfloat16), w2, preferred_element_type=jnp.float32)
         + params["b2"])
    poses = y.reshape(-1, num_poses, _SE2_SIZE)
    heading = jnp.tanh(poses[..., _HEADING]) * math.pi
    return poses.at[..., _HEADING].set(heading)


def _reference_forward_f32(object_queries, params, num_poses):
    """Full-f32 reference (matches the PyTorch module numerically up to bf16 cast)."""
    x = object_queries.reshape(-1, params["w1"].shape[0])
    h = jnp.maximum(x @ params["w1"] + params["b1"], 0.0)
    y = h @ params["w2"] + params["b2"]
    poses = y.reshape(-1, num_poses, _SE2_SIZE)
    heading = jnp.tanh(poses[..., _HEADING]) * math.pi
    return poses.at[..., _HEADING].set(heading)


if __name__ == "__main__":
    # Small shapes consistent with the module's forward.
    num_poses = 8
    d_model = 32
    d_ffn = 64
    batch = 2           # number of object queries (flattened to -1 in reshape)

    key = jax.random.PRNGKey(0)
    k_param, k_x = jax.random.split(key)

    params = init_trajectory_head_params(k_param, num_poses, d_ffn, d_model)
    object_queries = jax.random.normal(k_x, (batch, d_model), jnp.float32)

    out = trajectory_head_forward(object_queries, params, num_poses)
    traj = jax.block_until_ready(out["trajectory"])

    assert traj.shape == (batch, num_poses, _SE2_SIZE), traj.shape

    # Tight check vs. a reference that uses the same bf16-matmul / f32-accumulate math.
    ref_bf16 = _reference_forward_bf16(object_queries, params, num_poses)
    assert jnp.allclose(traj, ref_bf16, atol=2e-3, rtol=2e-3), "mismatch vs bf16 reference"

    # Loose check vs. the full-f32 module semantics (bf16 operand rounding only).
    ref_f32 = _reference_forward_f32(object_queries, params, num_poses)
    assert jnp.allclose(traj, ref_f32, atol=5e-2, rtol=5e-2), "mismatch vs f32 reference"

    print("KERNEL_OK")
</pallas_src>

<mosaic_0001>
module attributes {stable_mosaic.version = 11 : i64} {
  func.func @_trajectory_head_kernel(%arg0: i32, %arg1: memref<8x128xbf16, #tpu.memory_space<vmem>>, %arg2: memref<128x128xbf16, #tpu.memory_space<vmem>>, %arg3: memref<1x128xf32, #tpu.memory_space<vmem>>, %arg4: memref<128x128xbf16, #tpu.memory_space<vmem>>, %arg5: memref<1x128xf32, #tpu.memory_space<vmem>>, %arg6: memref<1x128xf32, #tpu.memory_space<vmem>>, %arg7: memref<8x128xf32, #tpu.memory_space<vmem>>) attributes {dimension_semantics = [#tpu.dimension_semantics<parallel>], iteration_bounds = array<i64: 1>, scalar_prefetch = 0 : i64, scratch_operands = 0 : i64, tpu.core_type = #tpu.core_type<tc>, window_params = [{transform_indices = @transform_0, window_bounds = array<i64: 8, 128>}, {pipeline_mode = #tpu.pipeline_mode<synchronous>, transform_indices = @transform_1, window_bounds = array<i64: 128, 128>}, {pipeline_mode = #tpu.pipeline_mode<synchronous>, transform_indices = @transform_2, window_bounds = array<i64: 1, 128>}, {pipeline_mode = #tpu.pipeline_mode<synchronous>, transform_indices = @transform_3, window_bounds = array<i64: 128, 128>}, {pipeline_mode = #tpu.pipeline_mode<synchronous>, transform_indices = @transform_4, window_bounds = array<i64: 1, 128>}, {pipeline_mode = #tpu.pipeline_mode<synchronous>, transform_indices = @transform_5, window_bounds = array<i64: 1, 128>}, {transform_indices = @transform_6, window_bounds = array<i64: 8, 128>}]} {
    %c0 = arith.constant 0 : index
    %c0_0 = arith.constant 0 : index
    %0 = vector.load %arg1[%c0, %c0_0] : memref<8x128xbf16, #tpu.memory_space<vmem>>, vector<8x128xbf16>
    %c0_1 = arith.constant 0 : index
    %c0_2 = arith.constant 0 : index
    %1 = vector.load %arg2[%c0_1, %c0_2] : memref<128x128xbf16, #tpu.memory_space<vmem>>, vector<128x128xbf16>
    %cst = arith.constant dense<0.000000e+00> : vector<8x128xf32>
    %2 = tpu.matmul %0, %1, %cst {dimension_numbers = #tpu.dot_dimension_numbers<[1], [0], [0], [1], [0, 0, 1, 1], [], []>} : vector<8x128xbf16>, vector<128x128xbf16>, vector<8x128xf32> -> vector<8x128xf32>
    %c0_3 = arith.constant 0 : index
    %c0_4 = arith.constant 0 : index
    %3 = vector.load %arg3[%c0_3, %c0_4] : memref<1x128xf32, #tpu.memory_space<vmem>>, vector<1x128xf32>
    %4 = vector.broadcast %3 : vector<1x128xf32> to vector<8x128xf32>
    %5 = arith.addf %2, %4 : vector<8x128xf32>
    %cst_5 = arith.constant 0.000000e+00 : f32
    %6 = vector.broadcast %cst_5 : f32 to vector<8x128xf32>
    %7 = arith.maximumf %5, %6 : vector<8x128xf32>
    %8 = arith.truncf %7 : vector<8x128xf32> to vector<8x128xbf16>
    %c0_6 = arith.constant 0 : index
    %c0_7 = arith.constant 0 : index
    %9 = vector.load %arg4[%c0_6, %c0_7] : memref<128x128xbf16, #tpu.memory_space<vmem>>, vector<128x128xbf16>
    %cst_8 = arith.constant dense<0.000000e+00> : vector<8x128xf32>
    %10 = tpu.matmul %8, %9, %cst_8 {dimension_numbers = #tpu.dot_dimension_numbers<[1], [0], [0], [1], [0, 0, 1, 1], [], []>} : vector<8x128xbf16>, vector<128x128xbf16>, vector<8x128xf32> -> vector<8x128xf32>
    %c0_9 = arith.constant 0 : index
    %c0_10 = arith.constant 0 : index
    %11 = vector.load %arg5[%c0_9, %c0_10] : memref<1x128xf32, #tpu.memory_space<vmem>>, vector<1x128xf32>
    %12 = vector.broadcast %11 : vector<1x128xf32> to vector<8x128xf32>
    %13 = arith.addf %10, %12 : vector<8x128xf32>
    %c0_11 = arith.constant 0 : index
    %c0_12 = arith.constant 0 : index
    %14 = vector.load %arg6[%c0_11, %c0_12] : memref<1x128xf32, #tpu.memory_space<vmem>>, vector<1x128xf32>
    %15 = math.tanh %13 : vector<8x128xf32>
    %cst_13 = arith.constant 3.14159274 : f32
    %16 = vector.broadcast %cst_13 : f32 to vector<8x128xf32>
    %17 = arith.mulf %15, %16 : vector<8x128xf32>
    %18 = arith.subf %17, %13 : vector<8x128xf32>
    %19 = vector.broadcast %14 : vector<1x128xf32> to vector<8x128xf32>
    %20 = arith.mulf %19, %18 : vector<8x128xf32>
    %21 = arith.addf %13, %20 : vector<8x128xf32>
    %c0_14 = arith.constant 0 : index
    %c0_15 = arith.constant 0 : index
    %22 = vector.load %arg7[%c0_14, %c0_15] : memref<8x128xf32, #tpu.memory_space<vmem>>, vector<8x128xf32>
    tpu.vector_store %arg7[%c0_14, %c0_15], %21 {strides = array<i32>} : memref<8x128xf32, #tpu.memory_space<vmem>>, vector<8x128xf32>,
    return
  }
  func.func @transform_0(%arg0: i32) -> (i32, i32) {
    %c0_i32 = arith.constant 0 : i32
    %c0_i32_0 = arith.constant 0 : i32
    return %arg0, %c0_i32 : i32, i32
  }
  func.func @transform_1(%arg0: i32) -> (i32, i32) {
    %c0_i32 = arith.constant 0 : i32
    %c0_i32_0 = arith.constant 0 : i32
    %c0_i32_1 = arith.constant 0 : i32
    return %c0_i32, %c0_i32_0 : i32, i32
  }
  func.func @transform_2(%arg0: i32) -> (i32, i32) {
    %c0_i32 = arith.constant 0 : i32
    %c0_i32_0 = arith.constant 0 : i32
    %c0_i32_1 = arith.constant 0 : i32
    return %c0_i32, %c0_i32_0 : i32, i32
  }
  func.func @transform_3(%arg0: i32) -> (i32, i32) {
    %c0_i32 = arith.constant 0 : i32
    %c0_i32_0 = arith.constant 0 : i32
    %c0_i32_1 = arith.constant 0 : i32
    return %c0_i32, %c0_i32_0 : i32, i32
  }
  func.func @transform_4(%arg0: i32) -> (i32, i32) {
    %c0_i32 = arith.constant 0 : i32
    %c0_i32_0 = arith.constant 0 : i32
    %c0_i32_1 = arith.constant 0 : i32
    return %c0_i32, %c0_i32_0 : i32, i32
  }
  func.func @transform_5(%arg0: i32) -> (i32, i32) {
    %c0_i32 = arith.constant 0 : i32
    %c0_i32_0 = arith.constant 0 : i32
    %c0_i32_1 = arith.constant 0 : i32
    return %c0_i32, %c0_i32_0 : i32, i32
  }
  func.func @transform_6(%arg0: i32) -> (i32, i32) {
    %c0_i32 = arith.constant 0 : i32
    %c0_i32_0 = arith.constant 0 : i32
    return %arg0, %c0_i32 : i32, i32
  }
}

</mosaic_0001>

<bundles_post_ra>
// kernel: tpu_custom_call.1
= control target key start
LH: loop header
LB: loop body
LE: loop exit
PB: predicated region body
PF: predicated region fallthrough
CT: control target
= control target key end

     0   :  { %11 = vsyncpa [#allocation3], 0  ;;  %s621_s0 = inlined_call_operand.hbm [shape: bf16[8,128], index: 0, kind: input, shape index: {}]   ;;  %s622_s1 = inlined_call_operand.hbm [shape: bf16[128,128], index: 1, kind: input, shape index: {}]   ;;  %s623_s2 = inlined_call_operand.vmem [shape: f32[1,128], index: 2, kind: input, shape index: {}]   ;;  %s624_s3 = inlined_call_operand.hbm [shape: bf16[128,128], index: 3, kind: input, shape index: {}]   ;;  %s625_s4 = inlined_call_operand.vmem [shape: f32[1,128], index: 4, kind: input, shape index: {}]   ;;  %s626_s5 = inlined_call_operand.vmem [shape: f32[1,128], index: 5, kind: input, shape index: {}]   ;;  %s627_s6 = inlined_call_operand.hbm [shape: f32[8,128], index: 6, kind: output, shape index: {}]  }
   0x1   :  { %12 = vsyncpa [#allocation6], 0 }
   0x2   :  { %13 = vsyncpa [#allocation4], 0  ;;  %s515_s21 = smov [#allocation5]   ;;  %s421_s25 = scalar_lea.hbm %s622_s1, 1024 }
   0x3   :  { %s29_s22 = sshll.u32 %s515_s21, 4  ;;  %p422_p0 = scmp.ne.s32.totalorder %s622_s1, %s421_s25  ;;  %s30_s22 = int_to_ptr.vmem [resolvable:$true] %s29_s22 }
   0x4   :  { %p425_p1 = scmp.lt.u32.totalorder %s421_s25, %s622_s1 }
   0x6   :  { %p427_p2 = pnand %p425_p1, %p422_p0 }
   0x8   :  { %430 = shalt.err (!%p427_p2)
}
   0x9   :  { %s431_s30 = scalar_lea.vmem %s30_s22, 1024  ;;  %p436_p4 = scmp.lt.s32.totalorder %s30_s22, %s30_s22 }
   0xa   :  { %p432_p3 = scmp.ne.s32.totalorder %s30_s22, %s431_s30  ;;  %p437_p5 = scmp.lt.s32.totalorder %s431_s30, %s431_s30 }
   0xc   :  { %p438_p6 = por %p437_p5, %p436_p4 }
   0xe   :  { %p439_p7 = pnand %p438_p6, %p432_p3 }
  0x10   :  { %442 = shalt.err (!%p439_p7)
}
  0x11   :  { %s516_s7 = smov 64   ;;  %s517_s8 = smov 4  }
  0x12   :  { %35 = dma.hbm_to_vmem [thread:$0]  %s622_s1, 1024, %s30_s22, [#allocation6], %s516_s7, %s516_s7, %s517_s8  }
  0x13   :  { %s518_s11 = smov [#allocation2]   ;;  %s519_s13 = smov [#allocation7]  }
  0x14   :  { %s20_s12 = sshll.u32 %s518_s11, 4  ;;  %s43_s14 = sshll.u32 %s519_s13, 4  ;;  %s21_s12 = int_to_ptr.vmem [resolvable:$true] %s20_s12  ;;  %s44_s14 = int_to_ptr.vmem [resolvable:$true] %s43_s14 }
  0x15   :  { %s443_s17 = scalar_lea.hbm %s621_s0, 64 }
  0x16   :  { %p444_p8 = scmp.ne.s32.totalorder %s621_s0, %s443_s17  ;;  %p447_p9 = scmp.lt.u32.totalorder %s443_s17, %s621_s0 }
  0x18   :  { %p449_p10 = pnand %p447_p9, %p444_p8 }
  0x1a   :  { %452 = shalt.err (!%p449_p10)
}
  0x1b   :  { %s453_s1 = scalar_lea.vmem %s21_s12, 64  ;;  %p458_p12 = scmp.lt.s32.totalorder %s21_s12, %s21_s12 }
  0x1c   :  { %p454_p11 = scmp.ne.s32.totalorder %s21_s12, %s453_s1  ;;  %p459_p13 = scmp.lt.s32.totalorder %s453_s1, %s453_s1 }
  0x1e   :  { %p460_p0 = por %p459_p13, %p458_p12 }
  0x20   :  { %p461_p1 = pnand %p460_p0, %p454_p11 }
  0x22   :  { %464 = shalt.err (!%p461_p1)
}
  0x23   :  { %23 = dma.hbm_to_vmem [thread:$0]  %s621_s0, 64, %s21_s12, [#allocation3]  }
  0x24   :  { %s465_s26 = scalar_lea.hbm %s624_s3, 1024 }
  0x25   :  { %p466_p2 = scmp.ne.s32.totalorder %s624_s3, %s465_s26  ;;  %p469_p3 = scmp.lt.u32.totalorder %s465_s26, %s624_s3 }
  0x27   :  { %p471_p4 = pnand %p469_p3, %p466_p2 }
  0x29   :  { %474 = shalt.err (!%p471_p4)
}
  0x2a   :  { %s475_s9 = scalar_lea.vmem %s44_s14, 1024  ;;  %p480_p6 = scmp.lt.s32.totalorder %s44_s14, %s44_s14 }
  0x2b   :  { %p476_p5 = scmp.ne.s32.totalorder %s44_s14, %s475_s9  ;;  %p481_p7 = scmp.lt.s32.totalorder %s475_s9, %s475_s9 }
  0x2d   :  { %p482_p8 = por %p481_p7, %p480_p6 }
  0x2f   :  { %p483_p9 = pnand %p482_p8, %p476_p5 }
  0x31   :  { %486 = shalt.err (!%p483_p9)
}
  0x32   :  { %49 = dma.hbm_to_vmem [thread:$0]  %s624_s3, 1024, %s44_s14, [#allocation6], %s516_s7, %s516_s7, %s517_s8  }
  0x33   :  { %509 = dma.done.wait [#allocation3], 64  }
  0x34   :  { %510 = vsyncadd [#allocation3], 4294967232 }
  0x35   :  { %511 = dma.done.wait [#allocation6], 2048  }
  0x36   :  { %512 = vsyncadd [#allocation6], 4294965248  ;;  %v520_v0 = vmov 0.0   ;;  %vm521_vm0 = vmmov 0   ;;  %v403_v1 = vld [vmem:[#allocation5] sm:$0xff]   ;;  %v404_v2 = vld [vmem:[#allocation5 + $0x8] sm:$0xff]  }
  0x37   :  { %355 = vmatprep.subr.bf16.mxu0 %v520_v0  ;;  %371 = vmatprep.mubr.msk.bf16.mxu0 %vm521_vm0, %v520_v0  ;;  %v405_v3 = vld [vmem:[#allocation5 + $0x10] sm:$0xff]   ;;  %v411_v4 = vld [vmem:[#allocation7] sm:$0xff]   ;;  %v406_v5 = vld [vmem:[#allocation5 + $0x18] sm:$0xff]   ;;  %s522_s13 = smov [#allocation8]  }
  0x38   :  { %375 = vmatprep.subr.bf16.mxu1 %v520_v0  ;;  %391 = vmatprep.mubr.msk.bf16.mxu1 %vm521_vm0, %v520_v0  ;;  %v412_v6 = vld [vmem:[#allocation7 + $0x8] sm:$0xff]   ;;  %v407_v7 = vld [vmem:[#allocation5 + $0x20] sm:$0xff]   ;;  %v413_v8 = vld [vmem:[#allocation7 + $0x10] sm:$0xff]   ;;  %s308_s14 = sshll.u32 %s522_s13, 4  ;;  %s309_s14 = int_to_ptr.vmem [resolvable:$true] %s308_s14 }
  0x39   :  { %356 = vmatpush3.bf16.msra.mxu0 %v403_v1  ;;  %376 = vmatpush3.bf16.msra.mxu1 %v411_v4  ;;  %v408_v9 = vld [vmem:[#allocation5 + $0x28] sm:$0xff]   ;;  %v414_v10 = vld [vmem:[#allocation7 + $0x18] sm:$0xff]   ;;  %v409_v11 = vld [vmem:[#allocation5 + $0x30] sm:$0xff]   ;;  %p492_p11 = scmp.lt.s32.totalorder %s309_s14, %s309_s14 }
  0x3a   :  { %357 = vmatprep.subr.bf16.mxu0 %v520_v0  ;;  %377 = vmatprep.subr.bf16.mxu1 %v520_v0  ;;  %v415_v12 = vld [vmem:[#allocation7 + $0x20] sm:$0xff]   ;;  %v410_v13 = vld [vmem:[#allocation5 + $0x38] sm:$0xff]   ;;  %v416_v14 = vld [vmem:[#allocation7 + $0x28] sm:$0xff]  }
  0x3b   :  { %v64_v15 = vld [vmem:[#allocation2] sm:$0xf]  ;;  %v417_v16 = vld [vmem:[#allocation7 + $0x30] sm:$0xff]  }
  0x3c   :  { %v418_v17 = vld [vmem:[#allocation7 + $0x38] sm:$0xff]  }
  0x3d   :  { %358 = vmatpush3.bf16.msra.mxu0 %v404_v2  ;;  %378 = vmatpush3.bf16.msra.mxu1 %v412_v6  ;;  %v318_v18 = vld [vmem:[%s623_s2] ss:$0 sm:$0xff] }
  0x3e   :  { %359 = vmatprep.subr.bf16.mxu0 %v520_v0  ;;  %379 = vmatprep.subr.bf16.mxu1 %v520_v0  ;;  %v327_v26 = vld [vmem:[%s625_s4] ss:$0 sm:$0xff]  ;;  %s487_s4 = scalar_lea.vmem %s309_s14, 128 }
  0x3f   :  { %v336_v34 = vld [vmem:[%s626_s5] ss:$0 sm:$0xff]  ;;  %p488_p10 = scmp.ne.s32.totalorder %s309_s14, %s487_s4  ;;  %p493_p12 = scmp.lt.s32.totalorder %s487_s4, %s487_s4 }
  0x41   :  { %360 = vmatpush3.bf16.msra.mxu0 %v405_v3  ;;  %380 = vmatpush3.bf16.msra.mxu1 %v413_v8  ;;  %p494_p13 = por %p493_p12, %p492_p11 }
  0x42   :  { %361 = vmatprep.subr.bf16.mxu0 %v520_v0  ;;  %381 = vmatprep.subr.bf16.mxu1 %v520_v0 }
  0x43   :  { %p495_p0 = pnand %p494_p13, %p488_p10 }
  0x45   :  { %362 = vmatpush3.bf16.msra.mxu0 %v406_v5  ;;  %382 = vmatpush3.bf16.msra.mxu1 %v414_v10 }
  0x46   :  { %363 = vmatprep.subr.bf16.mxu0 %v520_v0  ;;  %383 = vmatprep.subr.bf16.mxu1 %v520_v0 }
  0x49   :  { %364 = vmatpush3.bf16.msra.mxu0 %v407_v7  ;;  %384 = vmatpush3.bf16.msra.mxu1 %v415_v12 }
  0x4a   :  { %365 = vmatprep.subr.bf16.mxu0 %v520_v0  ;;  %385 = vmatprep.subr.bf16.mxu1 %v520_v0 }
  0x4d   :  { %366 = vmatpush3.bf16.msra.mxu0 %v408_v9  ;;  %386 = vmatpush3.bf16.msra.mxu1 %v416_v14 }
  0x4e   :  { %367 = vmatprep.subr.bf16.mxu0 %v520_v0  ;;  %387 = vmatprep.subr.bf16.mxu1 %v520_v0 }
  0x51   :  { %368 = vmatpush3.bf16.msra.mxu0 %v409_v11  ;;  %388 = vmatpush3.bf16.msra.mxu1 %v417_v16 }
  0x52   :  { %369 = vmatprep.subr.bf16.mxu0 %v520_v0  ;;  %389 = vmatprep.subr.bf16.mxu1 %v520_v0 }
  0x55   :  { %370 = vmatpush3.bf16.msra.mxu0 %v410_v13  ;;  %390 = vmatpush3.bf16.msra.mxu1 %v418_v17 }
  0x58   :  { %372 = vmatmul.mubr.bf16.vlgmr.msra.gmra.mrb[0].mxu0 %v64_v15 }
 0x12b   :  { %v170_v19 = vpop.f32.mrb[0].mxu0 }
 0x12c   :  { %v171_v20 = vadd.f32 %v318_v18, %v170_v19  ;;  %v373_v21 = vpop.f32.mrb[1].mxu0 }
 0x12d   :  { %v173_v22 = vpop.f32.mrb[2].mxu0 }
 0x12e   :  { %v176_v23 = vmax.f32 %v171_v20, 0.0  ;;  %v374_v24 = vpop.f32.mrb[3].mxu0 }
 0x130   :  { %v177_v25 = vpack.c.bf16 %v176_v23, %v176_v23 }
 0x132   :  { %392 = vmatmul.mubr.bf16.vlgmr.msra.gmra.mrb[0].mxu1 %v177_v25 }
 0x205   :  { %v283_v27 = vpop.f32.mrb[0].mxu1 }
 0x206   :  { %v284_v28 = vadd.f32 %v327_v26, %v283_v27  ;;  %v393_v29 = vpop.f32.mrb[1].mxu1 }
 0x207   :  { %v286_v30 = vpop.f32.mrb[2].mxu1 }
 0x208   :  { %419 = vtanh.f32 %v284_v28  ;;  %v394_v31 = vpop.f32.mrb[3].mxu1 }
 0x212   :  { %v420_v32 = vpop.eup %419 }
 0x213   :  { %v291_v33 = vmul.f32 3.1415927, %v420_v32 }
 0x215   :  { %v292_v35 = vsub.f32 %v291_v33, %v284_v28 }
 0x217   :  { %v299_v36 = vmul.f32 %v336_v34, %v292_v35 }
 0x219   :  { %v300_v37 = vadd.f32 %v299_v36, %v284_v28 }
 0x21b   :  { %301 = vst [vmem:[#allocation8] sm:$0xff] %v300_v37 }
 0x21c   :  { %498 = shalt.err (!%p495_p0)
}
 0x21d   :  { %s499_s17 = scalar_lea.hbm %s627_s6, 128 }
 0x21e   :  { %p500_p1 = scmp.ne.s32.totalorder %s627_s6, %s499_s17  ;;  %p503_p2 = scmp.lt.u32.totalorder %s499_s17, %s627_s6 }
 0x220   :  { %p505_p3 = pnand %p503_p2, %p500_p1 }
 0x222   :  { %508 = shalt.err (!%p505_p3)
}
 0x223   :  { %311 = dma.vmem_to_hbm [thread:$0]  %s309_s14, 128, %s627_s6, [#allocation4]  }
 0x224   :  { %513 = dma.done.wait [#allocation4], 128  }
 0x225   :  { %514 = vsyncadd [#allocation4], 4294967168 }
 0x226   :  { %315 = vsyncpa [#allocation3], 1 }
 0x227   :  { %316 = vsyncpa [#allocation6], 1 }
 0x228   :  { %317 = vsyncpa [#allocation4], 1 }

</bundles_post_ra>
